<compile_context>
chip_gen: v7x
topology: tpu7x:2x2x1
jax: 0.10.0
libtpu: 0.0.40
codegen_flags: <defaults>
</compile_context>

<pallas_src>
import functools

import jax
import jax.numpy as jnp
from jax import lax
from jax.experimental import pallas as pl
from jax.experimental.pallas import tpu as pltpu

ALPHA = 0.1
TEMPERATURE = 10.0


def _round_up(x, m):
    return ((x + m - 1) // m) * m


def _distill_kernel(teacher_ref, student_ref, labels_ref, out_ref, *,
                    alpha, temperature, n_rows, block_b):
    i = pl.program_id(0)
    t = teacher_ref[...].astype(jnp.float32)   # (block_b, C)
    s = student_ref[...].astype(jnp.float32)   # (block_b, C)
    labels = labels_ref[...]                   # (block_b, 1) int32
    bB, C = s.shape
    inv_t = 1.0 / temperature

    # ---- shared student softmax statistics ----
    s_max = jnp.max(s, axis=1, keepdims=True)                     # (bB, 1)
    s_shift = s - s_max                                           # (bB, C)
    s_lse = jnp.log(jnp.sum(jnp.exp(s_shift), axis=1, keepdims=True))

    # ---- cross-entropy per row: ce = s_lse - s_shift[label] ----
    # (gather from the already-shifted logits; on v7x, if VALU/XLU binds, this
    #  gather could move to a wrapper-side take_along_axis of (B,1) logits.)
    col_ids = lax.broadcasted_iota(jnp.int32, (bB, C), 1)
    label_shift = jnp.sum(jnp.where(col_ids == labels, s_shift, 0.0),
                          axis=1, keepdims=True)                  # (bB, 1)
    ce_rows = s_lse - label_shift                                 # (bB, 1)

    # ---- temperature-scaled student log-softmax (reuses s_shift / s_max) ----
    sT_shift = s_shift * inv_t                                    # max(s/T) == max(s)/T
    sT_lse = jnp.log(jnp.sum(jnp.exp(sT_shift), axis=1, keepdims=True))

    # ---- teacher softmax at temperature T (scale AFTER the row max) ----
    tT_shift = (t - jnp.max(t, axis=1, keepdims=True)) * inv_t    # (bB, C)
    tT_exp = jnp.exp(tT_shift)
    tT_sum = jnp.sum(tT_exp, axis=1, keepdims=True)
    tT_logsum = jnp.log(tT_sum)

    # ---- per-row KL with the per-row constant folded out of the full-width diff:
    #   sum_c p_c*(log p_c - log q_c)
    #     = [sum_c e_c*(tT_shift_c - sT_shift_c)] / tT_sum + (sT_lse - tT_logsum)
    kl_inner = jnp.sum(tT_exp * (tT_shift - sT_shift), axis=1, keepdims=True)
    # approx=True (~2^-12 rel err) would be cheap here; exact keeps the 1e-5 check tight.
    kl_rows = kl_inner * pl.reciprocal(tT_sum, approx=False) + (sT_lse - tT_logsum)

    # ---- mask the ragged last block's rows; one scalar partial per grid block ----
    row_ids = i * block_b + lax.broadcasted_iota(jnp.int32, (bB, 1), 0)
    valid = row_ids < n_rows
    ce_sum = jnp.sum(jnp.where(valid, ce_rows, 0.0), axis=0, keepdims=True)   # (1, 1)
    kl_sum = jnp.sum(jnp.where(valid, kl_rows, 0.0), axis=0, keepdims=True)   # (1, 1)
    partial = (alpha * (temperature * temperature)) * kl_sum + (1.0 - alpha) * ce_sum
    out_ref[...] = partial.reshape(1, 1, 1)


def distillation_loss(teacher_preds, student_preds, labels,
                      alpha=ALPHA, temperature=TEMPERATURE, block_b=None):
    """teacher_preds, student_preds: (B, C) float (f32 or bf16); labels: (B,) int."""
    B, C = student_preds.shape
    assert teacher_preds.shape == (B, C)

    itemsize = jnp.dtype(student_preds.dtype).itemsize
    # VMEM bytes per batch row: 2 streamed inputs x 2 pipeline buffers at the input
    # dtype, plus ~8 live f32 (block_b, C) temporaries inside the kernel.
    bytes_per_row = C * (4 * itemsize + 8 * 4) + 8

    if block_b is None:
        cap = max(1, (20 << 20) // bytes_per_row)        # ~20 MiB tile budget
        if B <= cap:
            block_b = B                                  # full dim -> always layout-legal
        else:
            block_b = max(8, (min(cap, 1024) // 8) * 8)  # multiple of 8 sublanes
    num_blocks = pl.cdiv(B, block_b)

    labels_2d = jnp.asarray(labels).reshape(B, 1).astype(jnp.int32)

    kernel = functools.partial(
        _distill_kernel, alpha=float(alpha), temperature=float(temperature),
        n_rows=B, block_b=block_b)

    cost = pl.CostEstimate(
        flops=int(12 * B * C),
        transcendentals=int(3 * B * C + 4 * B),
        bytes_accessed=int(2 * B * C * itemsize + 4 * B + 4 * num_blocks),
    )

    # VMEM request sized from the tile budget; 40 MiB ceiling keeps headroom on
    # v7x (64 MiB physical / 32 MiB default scoped).
    vmem_limit = int(min(max(block_b * bytes_per_row + (2 << 20), 16 << 20), 40 << 20))

    partials = pl.pallas_call(
        kernel,
        out_shape=jax.ShapeDtypeStruct((num_blocks, 1, 1), jnp.float32),
        grid_spec=pltpu.PrefetchScalarGridSpec(
            num_scalar_prefetch=0,
            grid=(num_blocks,),
            in_specs=[
                pl.BlockSpec((block_b, C), lambda i: (i, 0)),
                pl.BlockSpec((block_b, C), lambda i: (i, 0)),
                pl.BlockSpec((block_b, 1), lambda i: (i, 0)),
            ],
            out_specs=pl.BlockSpec((1, 1, 1), lambda i: (i, 0, 0)),
        ),
        compiler_params=pltpu.CompilerParams(
            dimension_semantics=("parallel",),  # independent per-block partials -> megacore-shardable
            vmem_limit_bytes=vmem_limit,
        ),
        cost_estimate=cost,
    )(teacher_preds, student_preds, labels_2d)

    # Tiny reduction over num_blocks partials + mean over the *true* batch size.
    return jnp.sum(partials) / B


def _reference(teacher_preds, student_preds, labels, alpha=ALPHA, temperature=TEMPERATURE):
    t = teacher_preds.astype(jnp.float32)
    s = student_preds.astype(jnp.float32)
    s_logp = jax.nn.log_softmax(s, axis=1)
    ce = -jnp.mean(jnp.take_along_axis(s_logp, labels[:, None], axis=1))
    sT_logp = jax.nn.log_softmax(s / temperature, axis=1)
    t_prob = jax.nn.softmax(t / temperature, axis=1)
    t_logp = jax.nn.log_softmax(t / temperature, axis=1)
    kl = jnp.sum(t_prob * (t_logp - sT_logp)) / s.shape[0]
    return alpha * kl * temperature ** 2 + (1.0 - alpha) * ce


if __name__ == "__main__":
    key = jax.random.PRNGKey(0)
    k1, k2, k3 = jax.random.split(key, 3)

    # Small aligned case (single block).
    B, C = 8, 16
    teacher = jax.random.normal(k1, (B, C), dtype=jnp.float32) * 2.0
    student = jax.random.normal(k2, (B, C), dtype=jnp.float32) * 2.0
    labels = jax.random.randint(k3, (B,), 0, C, dtype=jnp.int32)
    loss = jax.block_until_ready(distillation_loss(teacher, student, labels))
    ref = _reference(teacher, student, labels)
    assert jnp.allclose(loss, ref, rtol=1e-5, atol=1e-5), (loss, ref)

    # Ragged case: B not a multiple of the row tile, C not a multiple of 128
    # (exercises the no-pad class axis and the masked ragged last batch block).
    B2, C2 = 13, 50
    t2 = jax.random.normal(k1, (B2, C2), dtype=jnp.float32) * 3.0
    s2 = jax.random.normal(k2, (B2, C2), dtype=jnp.float32) * 3.0
    l2 = jax.random.randint(k3, (B2,), 0, C2, dtype=jnp.int32)
    loss2 = jax.block_until_ready(distillation_loss(t2, s2, l2, block_b=8))
    ref2 = _reference(t2, s2, l2)
    assert jnp.allclose(loss2, ref2, rtol=1e-5, atol=1e-5), (loss2, ref2)

    print("KERNEL_OK")
</pallas_src>

<mosaic_0001>
module attributes {stable_mosaic.version = 11 : i64} {
  func.func @_distill_kernel(%arg0: i32, %arg1: memref<8x16xf32, #tpu.memory_space<vmem>>, %arg2: memref<8x16xf32, #tpu.memory_space<vmem>>, %arg3: memref<8x1xi32, #tpu.memory_space<vmem>>, %arg4: memref<1x1x1xf32, #tpu.memory_space<vmem>>) attributes {dimension_semantics = [#tpu.dimension_semantics<parallel>], iteration_bounds = array<i64: 1>, scalar_prefetch = 0 : i64, scratch_operands = 0 : i64, tpu.core_type = #tpu.core_type<tc>, window_params = [{transform_indices = @transform_0, window_bounds = array<i64: 8, 16>}, {transform_indices = @transform_1, window_bounds = array<i64: 8, 16>}, {transform_indices = @transform_2, window_bounds = array<i64: 8, 1>}, {transform_indices = @transform_3, window_bounds = array<i64: 1, 1, 1>}]} {
    %c0 = arith.constant 0 : index
    %c0_0 = arith.constant 0 : index
    %0 = vector.load %arg1[%c0, %c0_0] : memref<8x16xf32, #tpu.memory_space<vmem>>, vector<8x16xf32>
    %c0_1 = arith.constant 0 : index
    %c0_2 = arith.constant 0 : index
    %1 = vector.load %arg2[%c0_1, %c0_2] : memref<8x16xf32, #tpu.memory_space<vmem>>, vector<8x16xf32>
    %c0_3 = arith.constant 0 : index
    %c0_4 = arith.constant 0 : index
    %2 = vector.load %arg3[%c0_3, %c0_4] : memref<8x1xi32, #tpu.memory_space<vmem>>, vector<8x1xi32>
    %cst = arith.constant dense<0xFF800000> : vector<8xf32>
    %3 = vector.multi_reduction <maximumf>, %1, %cst [1] : vector<8x16xf32> to vector<8xf32>
    %4 = vector.shape_cast %3 : vector<8xf32> to vector<8x1xf32>
    %5 = vector.broadcast %4 : vector<8x1xf32> to vector<8x16xf32>
    %6 = arith.subf %1, %5 : vector<8x16xf32>
    %7 = math.exp %6 : vector<8x16xf32>
    %cst_5 = arith.constant dense<0.000000e+00> : vector<8xf32>
    %8 = vector.multi_reduction <add>, %7, %cst_5 [1] : vector<8x16xf32> to vector<8xf32>
    %9 = vector.shape_cast %8 : vector<8xf32> to vector<8x1xf32>
    %10 = math.log %9 : vector<8x1xf32>
    %11 = tpu.iota {dimensions = array<i32: 1>} : vector<8x16xi32>
    %12 = vector.broadcast %2 : vector<8x1xi32> to vector<8x16xi32>
    %13 = arith.cmpi eq, %11, %12 : vector<8x16xi32>
    %cst_6 = arith.constant 0.000000e+00 : f32
    %14 = vector.broadcast %cst_6 : f32 to vector<8x16xf32>
    %15 = arith.select %13, %6, %14 : vector<8x16xi1>, vector<8x16xf32>
    %cst_7 = arith.constant dense<0.000000e+00> : vector<8xf32>
    %16 = vector.multi_reduction <add>, %15, %cst_7 [1] : vector<8x16xf32> to vector<8xf32>
    %17 = vector.shape_cast %16 : vector<8xf32> to vector<8x1xf32>
    %18 = arith.subf %10, %17 : vector<8x1xf32>
    %cst_8 = arith.constant 1.000000e-01 : f32
    %19 = vector.broadcast %cst_8 : f32 to vector<8x16xf32>
    %20 = arith.mulf %6, %19 : vector<8x16xf32>
    %21 = math.exp %20 : vector<8x16xf32>
    %cst_9 = arith.constant dense<0.000000e+00> : vector<8xf32>
    %22 = vector.multi_reduction <add>, %21, %cst_9 [1] : vector<8x16xf32> to vector<8xf32>
    %23 = vector.shape_cast %22 : vector<8xf32> to vector<8x1xf32>
    %24 = math.log %23 : vector<8x1xf32>
    %cst_10 = arith.constant dense<0xFF800000> : vector<8xf32>
    %25 = vector.multi_reduction <maximumf>, %0, %cst_10 [1] : vector<8x16xf32> to vector<8xf32>
    %26 = vector.shape_cast %25 : vector<8xf32> to vector<8x1xf32>
    %27 = vector.broadcast %26 : vector<8x1xf32> to vector<8x16xf32>
    %28 = arith.subf %0, %27 : vector<8x16xf32>
    %cst_11 = arith.constant 1.000000e-01 : f32
    %29 = vector.broadcast %cst_11 : f32 to vector<8x16xf32>
    %30 = arith.mulf %28, %29 : vector<8x16xf32>
    %31 = math.exp %30 : vector<8x16xf32>
    %cst_12 = arith.constant dense<0.000000e+00> : vector<8xf32>
    %32 = vector.multi_reduction <add>, %31, %cst_12 [1] : vector<8x16xf32> to vector<8xf32>
    %33 = vector.shape_cast %32 : vector<8xf32> to vector<8x1xf32>
    %34 = math.log %33 : vector<8x1xf32>
    %35 = arith.subf %30, %20 : vector<8x16xf32>
    %36 = arith.mulf %31, %35 : vector<8x16xf32>
    %cst_13 = arith.constant dense<0.000000e+00> : vector<8xf32>
    %37 = vector.multi_reduction <add>, %36, %cst_13 [1] : vector<8x16xf32> to vector<8xf32>
    %38 = vector.shape_cast %37 : vector<8xf32> to vector<8x1xf32>
    %39 = tpu.reciprocal %33 : vector<8x1xf32> -> vector<8x1xf32>
    %40 = arith.mulf %38, %39 : vector<8x1xf32>
    %41 = arith.subf %24, %34 : vector<8x1xf32>
    %42 = arith.addf %40, %41 : vector<8x1xf32>
    %c8_i32 = arith.constant 8 : i32
    %43 = arith.muli %arg0, %c8_i32 : i32
    %44 = tpu.iota {dimensions = array<i32: 0>} : vector<8x1xi32>
    %45 = vector.broadcast %43 : i32 to vector<8x1xi32>
    %46 = arith.addi %45, %44 : vector<8x1xi32>
    %c8_i32_14 = arith.constant 8 : i32
    %47 = vector.broadcast %c8_i32_14 : i32 to vector<8x1xi32>
    %48 = arith.cmpi slt, %46, %47 : vector<8x1xi32>
    %cst_15 = arith.constant 0.000000e+00 : f32
    %49 = vector.broadcast %cst_15 : f32 to vector<8x1xf32>
    %50 = arith.select %48, %18, %49 : vector<8x1xi1>, vector<8x1xf32>
    %cst_16 = arith.constant dense<0.000000e+00> : vector<1xf32>
    %51 = vector.multi_reduction <add>, %50, %cst_16 [0] : vector<8x1xf32> to vector<1xf32>
    %52 = vector.shape_cast %51 : vector<1xf32> to vector<1x1xf32>
    %cst_17 = arith.constant 0.000000e+00 : f32
    %53 = vector.broadcast %cst_17 : f32 to vector<8x1xf32>
    %54 = arith.select %48, %42, %53 : vector<8x1xi1>, vector<8x1xf32>
    %cst_18 = arith.constant dense<0.000000e+00> : vector<1xf32>
    %55 = vector.multi_reduction <add>, %54, %cst_18 [0] : vector<8x1xf32> to vector<1xf32>
    %56 = vector.shape_cast %55 : vector<1xf32> to vector<1x1xf32>
    %cst_19 = arith.constant 1.000000e+01 : f32
    %57 = vector.broadcast %cst_19 : f32 to vector<1x1xf32>
    %58 = arith.mulf %57, %56 : vector<1x1xf32>
    %cst_20 = arith.constant 0.899999976 : f32
    %59 = vector.broadcast %cst_20 : f32 to vector<1x1xf32>
    %60 = arith.mulf %59, %52 : vector<1x1xf32>
    %61 = arith.addf %58, %60 : vector<1x1xf32>
    %62 = vector.shape_cast %61 : vector<1x1xf32> to vector<1x1x1xf32>
    %c0_21 = arith.constant 0 : index
    %c0_22 = arith.constant 0 : index
    %c0_23 = arith.constant 0 : index
    %63 = vector.load %arg4[%c0_21, %c0_22, %c0_23] : memref<1x1x1xf32, #tpu.memory_space<vmem>>, vector<1x1x1xf32>
    tpu.vector_store %arg4[%c0_21, %c0_22, %c0_23], %62 {strides = array<i32>} : memref<1x1x1xf32, #tpu.memory_space<vmem>>, vector<1x1x1xf32>,
    return
  }
  func.func @transform_0(%arg0: i32) -> (i32, i32) {
    %c0_i32 = arith.constant 0 : i32
    %c0_i32_0 = arith.constant 0 : i32
    return %arg0, %c0_i32 : i32, i32
  }
  func.func @transform_1(%arg0: i32) -> (i32, i32) {
    %c0_i32 = arith.constant 0 : i32
    %c0_i32_0 = arith.constant 0 : i32
    return %arg0, %c0_i32 : i32, i32
  }
  func.func @transform_2(%arg0: i32) -> (i32, i32) {
    %c0_i32 = arith.constant 0 : i32
    %c0_i32_0 = arith.constant 0 : i32
    return %arg0, %c0_i32 : i32, i32
  }
  func.func @transform_3(%arg0: i32) -> (i32, i32, i32) {
    %c0_i32 = arith.constant 0 : i32
    %c0_i32_0 = arith.constant 0 : i32
    %c0_i32_1 = arith.constant 0 : i32
    return %arg0, %c0_i32, %c0_i32_0 : i32, i32, i32
  }
}

</mosaic_0001>

<bundles_post_ra>
// kernel: tpu_custom_call.1
= control target key start
LH: loop header
LB: loop body
LE: loop exit
PB: predicated region body
PF: predicated region fallthrough
CT: control target
= control target key end

     0   :  { %8 = vsyncpa [#allocation3], 0  ;;  %s249_s0 = inlined_call_operand.vmem [shape: f32[8,16], index: 0, kind: input, shape index: {}]   ;;  %s250_s1 = inlined_call_operand.hbm [shape: f32[8,16], index: 1, kind: input, shape index: {}]   ;;  %s251_s2 = inlined_call_operand.vmem [shape: s32[8,1], index: 2, kind: input, shape index: {}]   ;;  %s252_s3 = inlined_call_operand.hbm [shape: f32[1,1,1], index: 3, kind: output, shape index: {}]  }
   0x1   :  { %9 = vsyncpa [#allocation4], 0  ;;  %s189_s12 = smov [#allocation2]   ;;  %s141_s16 = scalar_lea.hbm %s250_s1, 128 }
   0x2   :  { %s18_s13 = sshll.u32 %s189_s12, 4  ;;  %p142_p0 = scmp.ne.s32.totalorder %s250_s1, %s141_s16  ;;  %s19_s13 = int_to_ptr.vmem [resolvable:$true] %s18_s13 }
   0x3   :  { %p145_p1 = scmp.lt.u32.totalorder %s141_s16, %s250_s1 }
   0x5   :  { %p147_p2 = pnand %p145_p1, %p142_p0 }
   0x7   :  { %150 = shalt.err (!%p147_p2)
}
   0x8   :  { %s151_s21 = scalar_lea.vmem %s19_s13, 128  ;;  %p156_p4 = scmp.lt.s32.totalorder %s19_s13, %s19_s13 }
   0x9   :  { %p152_p3 = scmp.ne.s32.totalorder %s19_s13, %s151_s21  ;;  %p157_p5 = scmp.lt.s32.totalorder %s151_s21, %s151_s21 }
   0xb   :  { %p158_p6 = por %p157_p5, %p156_p4 }
   0xd   :  { %p159_p7 = pnand %p158_p6, %p152_p3 }
   0xf   :  { %162 = shalt.err (!%p159_p7)
}
  0x10   :  { %21 = dma.hbm_to_vmem [thread:$0]  %s250_s1, 128, %s19_s13, [#allocation3]  }
  0x11   :  { %185 = dma.done.wait [#allocation3], 128  }
  0x12   :  { %186 = vsyncadd [#allocation3], 4294967168  ;;  %v190_v0 = vmov 0   ;;  %vm30_vm0 = vcmask 130048   ;;  %v28_v1 = vld [vmem:[#allocation2] sm:$0xff]  ;;  %v42_v17 = vlaneseq  ;;  %vm105_vm2 = vcmask 0  }
  0x13   :  { %125 = vset.pattern.permute.xlu1 %v190_v0  ;;  %126 = vset.pattern.permute.xlu0 %v190_v0  ;;  %v27_v2 = vld [vmem:[%s249_s0] sm:$0xff]  ;;  %v31_v4 = vsel %vm30_vm0, %v28_v1, -inf  ;;  %s191_s0 = smov [#allocation5]  }
  0x14   :  { %v29_v3 = vld [vmem:[%s251_s2] sm:$0xff]  ;;  %32 = vmax.xlane.f32.xlu0 %v31_v4  ;;  %v61_v5 = vsel %vm30_vm0, %v27_v2, -inf  ;;  %v43_v21 = vand.u32 127, %v42_v17  ;;  %s113_s1 = sshll.u32 %s191_s0, 4  ;;  %s114_s1 = int_to_ptr.vmem [resolvable:$true] %s113_s1 }
  0x15   :  { %45 = vperm.xlu1 %125, %v29_v3   ;;  %s163_s2 = scalar_lea.vmem %s114_s1, 16  ;;  %s167_s28 = scalar_lea.vmem %s114_s1, 32 }
  0x16   :  { %p164_p8 = scmp.ne.s32.totalorder %s114_s1, %s163_s2  ;;  %p168_p9 = scmp.lt.s32.totalorder %s114_s1, %s114_s1 }
  0x17   :  { %p169_p10 = scmp.lt.s32.totalorder %s167_s28, %s163_s2 }
  0x18   :  { %62 = vmax.xlane.f32.xlu0 %v61_v5 }
  0x19   :  { %p170_p11 = por %p169_p10, %p168_p9 }
  0x1b   :  { %p171_p12 = pnand %p170_p11, %p164_p8 }
  0x94   :  { %v46_v23 = vpop.permute.xlu1 %45 }
  0x95   :  { %vm47_vm1 = vcmp.eq.s32.totalorder %v43_v21, %v46_v23 }
  0xa1   :  { %v33_v6 = vpop.xlane.xlu0 %32 }
  0xa2   :  { %v34_v7 = vsub.f32 %v28_v1, %v33_v6 }
  0xa4   :  { %v53_v8 = vmul.f32 0.1, %v34_v7  ;;  %v35_v13 = vmul.f32 1.442695, %v34_v7  ;;  %v48_v27 = vsel %vm47_vm1, %v34_v7, 0.0 }
  0xa5   :  { %v63_v9 = vpop.xlane.xlu0 %62  ;;  %v49_v28 = vsel %vm30_vm0, %v48_v27, 0.0 }
  0xa6   :  { %v54_v10 = vmul.f32 1.442695, %v53_v8  ;;  %v64_v11 = vsub.f32 %v27_v2, %v63_v9 }
  0xa8   :  { %127 = vpow2.f32 %v54_v10  ;;  %v65_v12 = vmul.f32 0.1, %v64_v11 }
  0xaa   :  { %v66_v14 = vmul.f32 1.442695, %v65_v12  ;;  %v73_v22 = vsub.f32 %v65_v12, %v53_v8 }
  0xac   :  { %129 = vpow2.f32 %v66_v14 }
  0xad   :  { %131 = vpow2.f32 %v35_v13 }
  0xb2   :  { %v128_v15 = vpop.eup %127 }
  0xb3   :  { %v56_v16 = vsel %vm30_vm0, %v128_v15, 0.0 }
  0xb4   :  { %57 = vadd.xlane.f32.xlu1 %v56_v16 }
  0xb6   :  { %v130_v18 = vpop.eup %129 }
  0xb7   :  { %v68_v19 = vsel %vm30_vm0, %v130_v18, 0.0  ;;  %v132_v20 = vpop.eup %131  ;;  %v74_v25 = vmul.f32 %v130_v18, %v73_v22 }
  0xb8   :  { %69 = vadd.xlane.f32.xlu0 %v68_v19  ;;  %v37_v24 = vsel %vm30_vm0, %v132_v20, 0.0 }
  0xb9   :  { %v75_v26 = vsel %vm30_vm0, %v74_v25, 0.0 }
  0xbc   :  { %38 = vadd.xlane.f32.xlu0 %v37_v24 }
  0xc0   :  { %76 = vadd.xlane.f32.xlu0 %v75_v26 }
  0xc4   :  { %50 = vadd.xlane.f32.xlu0 %v49_v28 }
 0x141   :  { %v58_v29 = vpop.xlane.xlu1 %57 }
 0x142   :  { %133 = vlog2.f32 %v58_v29 }
 0x145   :  { %v70_v30 = vpop.xlane.xlu0 %69 }
 0x146   :  { %135 = vlog2.f32 %v70_v30 }
 0x147   :  { %137 = vrcp.f32 %v70_v30 }
 0x149   :  { %v39_v31 = vpop.xlane.xlu0 %38 }
 0x14a   :  { %139 = vlog2.f32 %v39_v31 }
 0x14c   :  { %v134_v32 = vpop.eup %133 }
 0x14d   :  { %v77_v34 = vpop.xlane.xlu0 %76  ;;  %v60_v36 = vmul.f32 0.6931472, %v134_v32 }
 0x150   :  { %v136_v33 = vpop.eup %135 }
 0x151   :  { %v138_v35 = vpop.eup %137  ;;  %v72_v37 = vmul.f32 0.6931472, %v136_v33  ;;  %v51_v43 = vpop.xlane.xlu0 %50 }
 0x152   :  { %v79_v39 = vmul.f32 %v138_v35, %v77_v34 }
 0x153   :  { %v80_v38 = vsub.f32 %v60_v36, %v72_v37 }
 0x154   :  { %v140_v40 = vpop.eup %139 }
 0x155   :  { %v81_v41 = vadd.f32 %v80_v38, %v79_v39  ;;  %v41_v42 = vmul.f32 0.6931472, %v140_v40 }
 0x157   :  { %v96_v44 = vrot.slane %v81_v41, 4  ;;  %v52_v45 = vsub.f32 %v41_v42, %v51_v43 }
 0x159   :  { %v97_v46 = vadd.f32 %v96_v44, %v81_v41  ;;  %v89_v47 = vrot.slane %v52_v45, 4 }
 0x15b   :  { %v98_v48 = vrot.slane %v97_v46, 2  ;;  %v90_v49 = vadd.f32 %v89_v47, %v52_v45 }
 0x15d   :  { %v99_v50 = vadd.f32 %v98_v48, %v97_v46  ;;  %v91_v51 = vrot.slane %v90_v49, 2 }
 0x15f   :  { %v100_v52 = vrot.slane %v99_v50, 1  ;;  %v92_v53 = vadd.f32 %v91_v51, %v90_v49 }
 0x161   :  { %v101_v54 = vadd.f32 %v100_v52, %v99_v50  ;;  %v93_v55 = vrot.slane %v92_v53, 1 }
 0x163   :  { %v94_v56 = vadd.f32 %v93_v55, %v92_v53  ;;  %v102_v58 = vmul.f32 10.0, %v101_v54 }
 0x165   :  { %v103_v57 = vmul.f32 0.9, %v94_v56 }
 0x167   :  { %v104_v59 = vadd.f32 %v103_v57, %v102_v58 }
 0x169   :  { %106 = vst.msk [vmem:[#allocation5] sm:$0x1] %vm105_vm2, %v104_v59 }
 0x16a   :  { %174 = shalt.err (!%p171_p12)
}
 0x16b   :  { %s175_s4 = scalar_lea.hbm %s252_s3, 16 }
 0x16c   :  { %p176_p13 = scmp.ne.s32.totalorder %s252_s3, %s175_s4  ;;  %p179_p0 = scmp.lt.u32.totalorder %s175_s4, %s252_s3 }
 0x16e   :  { %p181_p1 = pnand %p179_p0, %p176_p13 }
 0x170   :  { %184 = shalt.err (!%p181_p1)
}
 0x171   :  { %116 = dma.vmem_to_hbm [thread:$0]  %s114_s1, 16, %s252_s3, [#allocation4]  }
 0x172   :  { %187 = dma.done.wait [#allocation4], 16  }
 0x173   :  { %188 = vsyncadd [#allocation4], 4294967280 }
 0x174   :  { %120 = vsyncpa [#allocation3], 1 }
 0x175   :  { %121 = vsyncpa [#allocation4], 1 }

</bundles_post_ra>
